<compile_context>
chip_gen: v7x
topology: tpu7x:2x2x1
jax: 0.10.0
libtpu: 0.0.40
codegen_flags: <defaults>
</compile_context>

<pallas_src>
import math
from types import SimpleNamespace

import jax
import jax.numpy as jnp
from jax.experimental import pallas as pl
from jax.experimental.pallas import tpu as pltpu

_LANE = 128


def _round_up(x, m):
    return -(-x // m) * m


def _round_down_min(x, m):
    return max(m, (x // m) * m)


# ----------------------------------------------------------------------------
# Pallas kernel: fused 1x1-conv heads in NCHW orientation (W @ X per image),
# writing the cls and reg slabs as two separate lane-dense outputs.
# ----------------------------------------------------------------------------
def _proposal_kernel(x_ref, w_cls_ref, b_cls_ref, w_reg_ref, b_reg_ref,
                     cls_ref, reg_ref):
    # x_ref:     (Bt, C_IN, TS)   feature tile, spatial along lanes
    # w_*_ref:   (n_*, C_IN)      resident weights
    # b_*_ref:   (n_*, 1)         resident biases
    # cls_ref:   (Bt, n_cls, TS)
    # reg_ref:   (Bt, n_reg, TS)
    for bi in range(x_ref.shape[0]):          # Bt is a static block dimension
        x = x_ref[bi]                                              # (C_IN, TS)
        cls = jnp.dot(w_cls_ref[...], x,
                      preferred_element_type=jnp.float32,
                      precision=jax.lax.Precision.HIGHEST)         # (n_cls, TS)
        reg = jnp.dot(w_reg_ref[...], x,
                      preferred_element_type=jnp.float32,
                      precision=jax.lax.Precision.HIGHEST)         # (n_reg, TS)
        cls_ref[bi] = (cls + b_cls_ref[...]).astype(cls_ref.dtype)
        reg_ref[bi] = (reg + b_reg_ref[...]).astype(reg_ref.dtype)


def _choose_tiles(B, S, c_in, n_out, *, target_ts=16384,
                  vmem_budget_bytes=16 << 20, min_step_bytes=2 << 20):
    """Pick (batch_tile, spatial_tile) for a (B, C_IN, S) -> (B, n_out, S) op."""
    bytes_per_col = (c_in + n_out) * 4          # f32 in + out bytes per spatial column

    # Spatial tile: as large as possible (big DMAs amortize the ~0.35 us fixed
    # per-grid-step cost), capped so the double-buffered in+out footprint stays
    # under vmem_budget_bytes -> safe on v5e/v6e/v7x scoped-VMEM defaults.
    ts_cap = _round_down_min(vmem_budget_bytes // (2 * bytes_per_col), _LANE)
    ts_max = min(target_ts, ts_cap)
    ts = S if S <= ts_max else ts_max           # multiple of 128 whenever < S

    # Batch tile: for small feature maps, process several images per grid step
    # so each step still moves ~min_step_bytes of HBM traffic.
    bt = 1
    if ts >= S:
        per_image = bytes_per_col * S
        bt = int(max(1, min(B, min_step_bytes // max(per_image, 1))))
        while B % bt:                           # keep only full batch blocks
            bt -= 1

    # Keep >= 2 grid steps along a "parallel" axis when possible so v7x's two
    # TensorCores both get work.
    if pl.cdiv(B, bt) * pl.cdiv(S, ts) < 2:
        if B >= 2:
            bt = max(1, B // 2)
            while B % bt:
                bt -= 1
        elif S >= 2 * _LANE:
            ts = _round_up(pl.cdiv(S, 2), _LANE)
    return bt, ts


def _fused_heads(x, w_cls, b_cls, w_reg, b_reg):
    """x: (B, C_IN, S) -> (cls_slab (B, n_cls, S), reg_slab (B, n_reg, S))."""
    B, C_IN, S = x.shape
    n_cls, n_reg = w_cls.shape[0], w_reg.shape[0]
    n_out = n_cls + n_reg

    bt, ts = _choose_tiles(B, S, C_IN, n_out)
    grid = (pl.cdiv(B, bt), pl.cdiv(S, ts))

    flops = 2 * B * S * C_IN * n_out
    bytes_accessed = 4 * (B * C_IN * S + n_out * (C_IN + 1) + B * n_out * S)

    return pl.pallas_call(
        _proposal_kernel,
        out_shape=(jax.ShapeDtypeStruct((B, n_cls, S), jnp.float32),
                   jax.ShapeDtypeStruct((B, n_reg, S), jnp.float32)),
        grid_spec=pltpu.PrefetchScalarGridSpec(
            num_scalar_prefetch=0,
            grid=grid,
            in_specs=[
                pl.BlockSpec((bt, C_IN, ts), lambda b, j: (b, 0, j)),   # X tile
                pl.BlockSpec((n_cls, C_IN), lambda b, j: (0, 0)),       # W cls (resident)
                pl.BlockSpec((n_cls, 1), lambda b, j: (0, 0)),          # b cls
                pl.BlockSpec((n_reg, C_IN), lambda b, j: (0, 0)),       # W reg (resident)
                pl.BlockSpec((n_reg, 1), lambda b, j: (0, 0)),          # b reg
            ],
            out_specs=[
                pl.BlockSpec((bt, n_cls, ts), lambda b, j: (b, 0, j)),
                pl.BlockSpec((bt, n_reg, ts), lambda b, j: (b, 0, j)),
            ],
        ),
        compiler_params=pltpu.CompilerParams(
            dimension_semantics=("parallel", "parallel"),
            vmem_limit_bytes=32 << 20),
        cost_estimate=pl.CostEstimate(
            flops=flops, transcendentals=0, bytes_accessed=bytes_accessed),
    )(x, w_cls, b_cls, w_reg, b_reg)


# ----------------------------------------------------------------------------
# ProposalLayer (forward only)
# ----------------------------------------------------------------------------
class ProposalLayer:
    def __init__(self, cfg, key):
        self.cfg = cfg
        C_IN = cfg.PROPOSAL.C_IN
        n_cls = cfg.NUM_CLASSES * cfg.NUM_YAW
        n_reg = cfg.NUM_CLASSES * cfg.NUM_YAW * cfg.BOX_DOF
        self.n_cls_out = n_cls

        k1, k2 = jax.random.split(key)
        # PyTorch conv weight shape is (C_OUT, C_IN, 1, 1); stored as (C_OUT, C_IN).
        # nn.init.normal_(std=0.01).
        self.w_cls = 0.01 * jax.random.normal(k1, (n_cls, C_IN), jnp.float32)
        self.w_reg = 0.01 * jax.random.normal(k2, (n_reg, C_IN), jnp.float32)
        # Bias values verbatim from the PyTorch source:
        #   nn.init.constant_(conv_cls.bias, -math.log(1 - 0.01) / 0.01)
        # (kept as-written, even though RetinaNet-style prior init would be
        #  -log((1 - 0.01) / 0.01)).
        self.b_cls = jnp.full((n_cls,), -math.log(1 - 0.01) / 0.01, jnp.float32)
        self.b_reg = jnp.zeros((n_reg,), jnp.float32)

        # ---- kernel-side parameters (built once at init, free) ----
        # PyTorch reshape_reg interprets reg channels as (NUM_CLASSES, BOX_DOF,
        # NUM_YAW); re-order rows to (NUM_CLASSES, NUM_YAW, BOX_DOF) so the
        # wrapper only needs (at most) the single DOF->last transpose.
        self._w_reg_k = (self.w_reg
                         .reshape(cfg.NUM_CLASSES, cfg.BOX_DOF, cfg.NUM_YAW, C_IN)
                         .transpose(0, 2, 1, 3)
                         .reshape(n_reg, C_IN))
        self._b_reg_k = (self.b_reg
                         .reshape(cfg.NUM_CLASSES, cfg.BOX_DOF, cfg.NUM_YAW)
                         .transpose(0, 2, 1)
                         .reshape(n_reg))[:, None]
        self._w_cls_k = self.w_cls
        self._b_cls_k = self.b_cls[:, None]

    def _heads(self, feature_map):
        cfg = self.cfg
        B, C_IN, ny, nx = feature_map.shape
        S = ny * nx
        # Pure view of the NCHW-contiguous input (no transpose / HBM pass).
        x = feature_map.reshape(B, C_IN, S)
        cls_slab, reg_slab = _fused_heads(
            x, self._w_cls_k, self._b_cls_k, self._w_reg_k, self._b_reg_k)
        cls_map = cls_slab.reshape(B, cfg.NUM_CLASSES, cfg.NUM_YAW, ny, nx)
        reg_knl = reg_slab.reshape(B, cfg.NUM_CLASSES, cfg.NUM_YAW,
                                   cfg.BOX_DOF, ny, nx)
        return cls_map, reg_knl

    def forward(self, feature_map):
        """feature_map: (B, C_IN, ny, nx) float32 (NCHW, as in PyTorch).

        Returns (cls_map, reg_map) with the module's layouts:
          cls_map: (B, NUM_CLASSES, NUM_YAW, ny, nx)
          reg_map: (B, NUM_CLASSES, NUM_YAW, ny, nx, BOX_DOF)
        """
        cls_map, reg_knl = self._heads(feature_map)
        # Single DOF->last transpose required by the module's output layout.
        # TODO(synk): downstream decode/top-k should consume forward_raw()'s
        # (B, C, YAW, DOF, ny, nx) layout directly (or fold this permute into
        # its own kernel) to avoid this extra HBM round trip of the reg slab.
        reg_map = jnp.transpose(reg_knl, (0, 1, 2, 4, 5, 3))
        return cls_map, reg_map

    def forward_raw(self, feature_map):
        """Kernel-native layouts: cls (B,C,YAW,ny,nx), reg (B,C,YAW,DOF,ny,nx)."""
        return self._heads(feature_map)

    __call__ = forward


# ----------------------------------------------------------------------------
# Pure-JAX reference (mimics the PyTorch module path exactly, including the
# PyTorch channel ordering + reshape_reg permute) for correctness checking.
# ----------------------------------------------------------------------------
def _reference_forward(layer, feature_map):
    cfg = layer.cfg
    B, C_IN, ny, nx = feature_map.shape
    cls_nchw = (jnp.einsum('oc,bcyx->boyx', layer.w_cls, feature_map)
                + layer.b_cls[None, :, None, None])
    reg_nchw = (jnp.einsum('oc,bcyx->boyx', layer.w_reg, feature_map)
                + layer.b_reg[None, :, None, None])
    cls_map = cls_nchw.reshape(B, cfg.NUM_CLASSES, cfg.NUM_YAW, ny, nx)
    reg_map = reg_nchw.reshape(B, cfg.NUM_CLASSES, cfg.BOX_DOF, cfg.NUM_YAW,
                               ny, nx)
    reg_map = jnp.transpose(reg_map, (0, 1, 3, 4, 5, 2))
    return cls_map, reg_map


# TODO(synk): inference()/_multiclass_batch_nms (topk + rotated NMS via
# batched_nms_rotated) is not part of forward(); rotated NMS has no clean
# Pallas equivalent and is omitted.

if __name__ == "__main__":
    cfg = SimpleNamespace(
        PROPOSAL=SimpleNamespace(C_IN=32, TOPK=8),
        NUM_CLASSES=2,
        NUM_YAW=2,
        BOX_DOF=7,
    )

    key = jax.random.PRNGKey(0)
    k_params, k_input = jax.random.split(key)

    layer = ProposalLayer(cfg, k_params)

    B, ny, nx = 2, 16, 16
    feature_map = jax.random.normal(k_input, (B, cfg.PROPOSAL.C_IN, ny, nx),
                                    jnp.float32)

    cls_map, reg_map = layer(feature_map)
    jax.block_until_ready((cls_map, reg_map))

    # Shape checks (match PyTorch module semantics).
    assert cls_map.shape == (B, cfg.NUM_CLASSES, cfg.NUM_YAW, ny, nx)
    assert reg_map.shape == (B, cfg.NUM_CLASSES, cfg.NUM_YAW, ny, nx,
                             cfg.BOX_DOF)

    # Numerical check against pure-JAX reference (PyTorch-layout path).
    cls_ref, reg_ref = _reference_forward(layer, feature_map)
    assert jnp.allclose(cls_map, cls_ref, atol=1e-5, rtol=1e-5)
    assert jnp.allclose(reg_map, reg_ref, atol=1e-5, rtol=1e-5)

    print("KERNEL_OK")
</pallas_src>

<mosaic_0001>
module attributes {stable_mosaic.version = 11 : i64} {
  func.func @_proposal_kernel(%arg0: i32, %arg1: i32, %arg2: memref<1x32x256xf32, #tpu.memory_space<vmem>>, %arg3: memref<4x32xf32, #tpu.memory_space<vmem>>, %arg4: memref<4x1xf32, #tpu.memory_space<vmem>>, %arg5: memref<28x32xf32, #tpu.memory_space<vmem>>, %arg6: memref<28x1xf32, #tpu.memory_space<vmem>>, %arg7: memref<1x4x256xf32, #tpu.memory_space<vmem>>, %arg8: memref<1x28x256xf32, #tpu.memory_space<vmem>>) attributes {dimension_semantics = [#tpu.dimension_semantics<parallel>, #tpu.dimension_semantics<parallel>], iteration_bounds = array<i64: 2, 1>, scalar_prefetch = 0 : i64, scratch_operands = 0 : i64, tpu.core_type = #tpu.core_type<tc>, window_params = [{transform_indices = @transform_0, window_bounds = array<i64: 1, 32, 256>}, {pipeline_mode = #tpu.pipeline_mode<synchronous>, transform_indices = @transform_1, window_bounds = array<i64: 4, 32>}, {pipeline_mode = #tpu.pipeline_mode<synchronous>, transform_indices = @transform_2, window_bounds = array<i64: 4, 1>}, {pipeline_mode = #tpu.pipeline_mode<synchronous>, transform_indices = @transform_3, window_bounds = array<i64: 28, 32>}, {pipeline_mode = #tpu.pipeline_mode<synchronous>, transform_indices = @transform_4, window_bounds = array<i64: 28, 1>}, {transform_indices = @transform_5, window_bounds = array<i64: 1, 4, 256>}, {transform_indices = @transform_6, window_bounds = array<i64: 1, 28, 256>}]} {
    %c0 = arith.constant 0 : index
    %c0_0 = arith.constant 0 : index
    %c0_1 = arith.constant 0 : index
    %0 = vector.load %arg2[%c0, %c0_0, %c0_1] : memref<1x32x256xf32, #tpu.memory_space<vmem>>, vector<1x32x256xf32>
    %1 = vector.shape_cast %0 : vector<1x32x256xf32> to vector<32x256xf32>
    %c0_2 = arith.constant 0 : index
    %c0_3 = arith.constant 0 : index
    %2 = vector.load %arg3[%c0_2, %c0_3] : memref<4x32xf32, #tpu.memory_space<vmem>>, vector<4x32xf32>
    %cst = arith.constant dense<0.000000e+00> : vector<4x256xf32>
    %3 = tpu.matmul %2, %1, %cst {dimension_numbers = #tpu.dot_dimension_numbers<[1], [0], [0], [1], [0, 0, 1, 1], [], []>, precision = #tpu.contract_precision<fp32>} : vector<4x32xf32>, vector<32x256xf32>, vector<4x256xf32> -> vector<4x256xf32>
    %c0_4 = arith.constant 0 : index
    %c0_5 = arith.constant 0 : index
    %4 = vector.load %arg5[%c0_4, %c0_5] : memref<28x32xf32, #tpu.memory_space<vmem>>, vector<28x32xf32>
    %cst_6 = arith.constant dense<0.000000e+00> : vector<28x256xf32>
    %5 = tpu.matmul %4, %1, %cst_6 {dimension_numbers = #tpu.dot_dimension_numbers<[1], [0], [0], [1], [0, 0, 1, 1], [], []>, precision = #tpu.contract_precision<fp32>} : vector<28x32xf32>, vector<32x256xf32>, vector<28x256xf32> -> vector<28x256xf32>
    %c0_7 = arith.constant 0 : index
    %c0_8 = arith.constant 0 : index
    %6 = vector.load %arg4[%c0_7, %c0_8] : memref<4x1xf32, #tpu.memory_space<vmem>>, vector<4x1xf32>
    %7 = vector.broadcast %6 : vector<4x1xf32> to vector<4x256xf32>
    %8 = arith.addf %3, %7 : vector<4x256xf32>
    %c0_9 = arith.constant 0 : index
    %c0_10 = arith.constant 0 : index
    %c0_11 = arith.constant 0 : index
    %9 = vector.load %arg7[%c0_9, %c0_10, %c0_11] : memref<1x4x256xf32, #tpu.memory_space<vmem>>, vector<1x4x256xf32>
    %10 = vector.shape_cast %9 : vector<1x4x256xf32> to vector<4x256xf32>
    %11 = vector.shape_cast %8 : vector<4x256xf32> to vector<1x4x256xf32>
    tpu.vector_store %arg7[%c0_9, %c0_10, %c0_11], %11 {strides = array<i32>} : memref<1x4x256xf32, #tpu.memory_space<vmem>>, vector<1x4x256xf32>,
    %c0_12 = arith.constant 0 : index
    %c0_13 = arith.constant 0 : index
    %12 = vector.load %arg6[%c0_12, %c0_13] : memref<28x1xf32, #tpu.memory_space<vmem>>, vector<28x1xf32>
    %13 = vector.broadcast %12 : vector<28x1xf32> to vector<28x256xf32>
    %14 = arith.addf %5, %13 : vector<28x256xf32>
    %c0_14 = arith.constant 0 : index
    %c0_15 = arith.constant 0 : index
    %c0_16 = arith.constant 0 : index
    %15 = vector.load %arg8[%c0_14, %c0_15, %c0_16] : memref<1x28x256xf32, #tpu.memory_space<vmem>>, vector<1x28x256xf32>
    %16 = vector.shape_cast %15 : vector<1x28x256xf32> to vector<28x256xf32>
    %17 = vector.shape_cast %14 : vector<28x256xf32> to vector<1x28x256xf32>
    tpu.vector_store %arg8[%c0_14, %c0_15, %c0_16], %17 {strides = array<i32>} : memref<1x28x256xf32, #tpu.memory_space<vmem>>, vector<1x28x256xf32>,
    return
  }
  func.func @transform_0(%arg0: i32, %arg1: i32) -> (i32, i32, i32) {
    %c0_i32 = arith.constant 0 : i32
    %c0_i32_0 = arith.constant 0 : i32
    return %arg0, %c0_i32, %arg1 : i32, i32, i32
  }
  func.func @transform_1(%arg0: i32, %arg1: i32) -> (i32, i32) {
    %c0_i32 = arith.constant 0 : i32
    %c0_i32_0 = arith.constant 0 : i32
    %c0_i32_1 = arith.constant 0 : i32
    return %c0_i32, %c0_i32_0 : i32, i32
  }
  func.func @transform_2(%arg0: i32, %arg1: i32) -> (i32, i32) {
    %c0_i32 = arith.constant 0 : i32
    %c0_i32_0 = arith.constant 0 : i32
    %c0_i32_1 = arith.constant 0 : i32
    return %c0_i32, %c0_i32_0 : i32, i32
  }
  func.func @transform_3(%arg0: i32, %arg1: i32) -> (i32, i32) {
    %c0_i32 = arith.constant 0 : i32
    %c0_i32_0 = arith.constant 0 : i32
    %c0_i32_1 = arith.constant 0 : i32
    return %c0_i32, %c0_i32_0 : i32, i32
  }
  func.func @transform_4(%arg0: i32, %arg1: i32) -> (i32, i32) {
    %c0_i32 = arith.constant 0 : i32
    %c0_i32_0 = arith.constant 0 : i32
    %c0_i32_1 = arith.constant 0 : i32
    return %c0_i32, %c0_i32_0 : i32, i32
  }
  func.func @transform_5(%arg0: i32, %arg1: i32) -> (i32, i32, i32) {
    %c0_i32 = arith.constant 0 : i32
    %c0_i32_0 = arith.constant 0 : i32
    return %arg0, %c0_i32, %arg1 : i32, i32, i32
  }
  func.func @transform_6(%arg0: i32, %arg1: i32) -> (i32, i32, i32) {
    %c0_i32 = arith.constant 0 : i32
    %c0_i32_0 = arith.constant 0 : i32
    return %arg0, %c0_i32, %arg1 : i32, i32, i32
  }
}

</mosaic_0001>

<bundles_post_ra>
// kernel: tpu_custom_call.1
= control target key start
LH: loop header
LB: loop body
LE: loop exit
PB: predicated region body
PF: predicated region fallthrough
CT: control target
= control target key end

     0   :  { %12 = vsyncpa [#allocation3], 0  ;;  %s2590_s0 = inlined_call_operand.hbm [shape: f32[2,32,256], index: 0, kind: input, shape index: {}]   ;;  %s2591_s1 = inlined_call_operand.vmem [shape: f32[4,32], index: 1, kind: input, shape index: {}]   ;;  %s2592_s2 = inlined_call_operand.vmem [shape: f32[4,1], index: 2, kind: input, shape index: {}]   ;;  %s2593_s3 = inlined_call_operand.vmem [shape: f32[28,32], index: 3, kind: input, shape index: {}]   ;;  %s2594_s4 = inlined_call_operand.vmem [shape: f32[28,1], index: 4, kind: input, shape index: {}]   ;;  %s2595_s5 = inlined_call_operand.hbm [shape: f32[2,4,256], index: 5, kind: output, shape index: {0}]   ;;  %s2596_s6 = inlined_call_operand.vmem [shape: f32[2,28,256], index: 6, kind: output, shape index: {1}]  }
   0x1   :  { %14 = vsyncpa [#allocation3 + $0x1], 0 }
   0x2   :  { %15 = vsyncpa [#allocation4], 0 }
   0x3   :  { %17 = vsyncpa [#allocation4 + $0x1], 0  ;;  %s2173_s21 = smov 0   ;;  %s2175_s22 = smov 0  }
   0x4   :  { %s2177_s23 = smov 0   ;;  %s2179_s24 = smov 0  }
   0x5   :  { %s2181_s25 = smov 0   ;;  %s2183_s26 = smov 0  }
   0x6 LB: > { %s1770_s27 = sadd.s32 4294967295, %s2130_s26   ;;  %s1771_s28 = sadd.s32 4294967294, %s2130_s26   ;;  %s2130_s26 = sphi %s2183_s26, %s23_s26   ;;  %s2126_s25 = sphi %s2181_s25, %s2611_s25   ;;  %s2122_s24 = sphi %s2179_s24, %s2610_s24   ;;  %s2118_s23 = sphi %s2177_s23, %s2609_s23   ;;  %s2114_s22 = sphi %s2175_s22, %s2608_s22   ;;  %s2110_s21 = sphi %s2173_s21, %s2607_s21  }
   0x7   : > { %s35_s29 = sadd.s32 1, %s2126_s25  ;;  %s44_s30 = sadd.s32 1, %s2118_s23 }
   0x8   : > { %p37_p0 = scmp.ge.s32.totalorder %s35_s29, 2  ;;  %p51_p1 = scmp.ne.s32.totalorder %s2118_s23, %s2114_s22 }
   0x9   : > { %p52_p2 = scmp.eq.s32.totalorder %s2130_s26, 0  ;;  %p57_p3 = scmp.ne.s32.totalorder %s2114_s22, %s2110_s21 }
   0xa   : > { %s2613_s29 = smov (%p37_p0, %s35_s29), 0  ;;  %p58_p5 = scmp.eq.s32.totalorder %s1770_s27, 0 }
   0xb   : > { %p2214_p4 = por %p52_p2, %p51_p1  ;;  %s39_s8 = ssub.s32 %s2126_s25, %s2613_s29 }
   0xc   : > { %p167_p6 = scmp.eq.s32.totalorder %s1770_s27, 1  ;;  %p42_p7 = scmp.eq.s32.totalorder %s39_s8, 0 }
   0xd   : > { %p2220_p8 = por %p58_p5, %p57_p3  ;;  %p173_p10 = scmp.eq.s32.totalorder %s1771_s28, 1 }
   0xe   : > { %p2224_p9 = por %p167_p6, %p51_p1  ;;  %p1962_p13 = scmp.lt.s32.totalorder %s2130_s26, 2 }
   0xf   : > { %s2229_s11 = scalar_select %p42_p7, %s2118_s23, %s44_s30  }
  0x10   : > { %s2600_s10 = scalar_select %p2224_p9, 1, 0 }
  0x11   : > { %p2231_p11 = por %p173_p10, %p57_p3  ;;  %s233_s13 = sand.u32 1, %s2118_s23  }
  0x12   : > { %s1774_s14 = sshll.u32 %s233_s13, 6  ;;  %s1787_s15 = sshll.u32 %s2126_s25, 10 }
  0x13   : > { %s2601_s12 = scalar_select %p2231_p11, 1, 0 }
  0x14   : > { %s2242_s18 = scalar_lea.hbm %s2590_s0, %s1787_s15  ;;  %s237_s19 = scalar_lea.vmem [#allocation2], %s1774_s14 }
  0x15   : > { %s246_s20 = sshll.u32 %s237_s19, 4  ;;  %p2248_p0 = pnand %p1962_p13, %p2214_p4  ;;  %s2244_s20 = int_to_ptr.vmem [resolvable:$true] %s246_s20 }
  0x16   : > { %s2253_s28 = scalar_lea.sflag [#allocation3], %s233_s13  ;;  %s2018_s30 = scalar_lea.hbm %s2242_s18, 1024 }
  0x17   : > { %p2019_p2 = scmp.ne.s32.totalorder %s2242_s18, %s2018_s30  ;;  %p2020_p3 = pneg %p2248_p0 }
  0x18   : > { %s2023_s7 = scalar_lea.hbm %s2590_s0, 2048  ;;  %p2024_p4 = scmp.lt.u32.totalorder %s2242_s18, %s2590_s0 }
  0x19   : > { %p2021_p5 = pnand %p2020_p3, %p2019_p2  ;;  %p2025_p7 = scmp.lt.u32.totalorder %s2023_s7, %s2018_s30 }
  0x1a   : > { %p2027_p13 = scmp.lt.u32.totalorder %s2018_s30, %s2242_s18 }
  0x1b   : > { %p2022_p6 = pneg %p2021_p5  ;;  %p2026_p10 = por %p2025_p7, %p2024_p4 }
  0x1d   : > { %p2028_p12 = por %p2027_p13, %p2026_p10 }
  0x1f   : > { %p2029_p1 = pnand %p2028_p12, %p2022_p6 }
  0x21   : > { %2032 = shalt.err (!%p2029_p1)
}
  0x22   : > { %s2033_s13 = scalar_lea.vmem %s2244_s20, 1024  ;;  %s2132_s17 = smov [#allocation2]  }
  0x23   : > { %p2034_p2 = scmp.ne.s32.totalorder %s2244_s20, %s2033_s13  ;;  %s2038_s19 = sshll.u32 %s2132_s17, 4  ;;  %s2039_s19 = int_to_ptr.vmem [resolvable:$false] %s2038_s19 }
  0x24   : > { %s2040_s8 = scalar_lea.vmem %s2039_s19, 2048  ;;  %p2041_p9 = scmp.lt.s32.totalorder %s2244_s20, %s2039_s19 }
  0x25   : > { %p2036_p5 = pnand %p2034_p2, %p2020_p3  ;;  %p2042_p4 = scmp.lt.s32.totalorder %s2040_s8, %s2033_s13 }
  0x27   : > { %p2037_p11 = pneg %p2036_p5  ;;  %p2043_p7 = por %p2042_p4, %p2041_p9 }
  0x29   : > { %p2044_p10 = pnand %p2043_p7, %p2037_p11 }
  0x2b   : > { %2047 = shalt.err (!%p2044_p10)
}
  0x2c   : > { %s2133_s30 = smov 256   ;;  %s2134_s14 = smov 16  }
  0x2d   : > { %1957 = dma.hbm_to_vmem [thread:$0]  (!%p2248_p0), %s2242_s18, 1024, %s2244_s20, %s2253_s28, %s2133_s30, %s2133_s30, %s2134_s14  }
  0x2e   : > { %p254_p12 = scmp.lt.s32.totalorder %s2130_s26, 3  ;;  %p2603_p1 = scmp.ge.s32.totalorder %s2130_s26, 1 }
  0x30   : > { %p255_p3 = pnand %p2603_p1, %p254_p12 }
  0x31   : > { %s2285_s7 = sand.u32 (!%p255_p3), 1, %s2114_s22  }
  0x32   : > { %258 = sbr.rel (%p255_p3) target bundleno = 367 (0x16f), region = 40  ;;  %s1778_s15 = sshll.u32 (!%p255_p3), %s2285_s7, 6 }
  0x33   : > { %s261_s16 = scalar_lea.sflag (!%p255_p3), [#allocation3], %s2285_s7  ;;  %s264_s13 = scalar_lea.vmem (!%p255_p3), [#allocation2], %s1778_s15 }
  0x39   : > { %2101 = dma.done.wait (%p2220_p8), %s261_s16, 1024  }
  0x3a   : > { %2103 = vsyncadd (%p2220_p8), %s261_s16, 4294966272  ;;  %v2135_v0 = vmov 0.0   ;;  %v2136_v1 = vmov 0   ;;  %v315_v2 = vld [vmem:[%s264_s13 + $0x8] sm:$0xff]  ;;  %v317_v3 = vld [vmem:[%s264_s13 + $0x18] sm:$0xff]  ;;  %vm333_vm0 = vcmask 261120  }
  0x3b   : > { %409 = vmatprep.mubr.f32.mxu0 %v2135_v0  ;;  %1156 = vmatprep.mubr.f32.mxu1 %v2135_v0  ;;  %v314_v4 = vld [vmem:[%s264_s13] sm:$0xff]  ;;  %v337_v5 = vand.u32 4294901760, %v315_v2  ;;  %v341_v6 = vand.u32 4294901760, %v317_v3  ;;  %v316_v7 = vld [vmem:[%s264_s13 + $0x10] sm:$0xff]  ;;  %v319_v9 = vld [vmem:[%s264_s13 + $0x28] sm:$0xff]  ;;  %s1779_s8 = sshll.u32 %s2285_s7, 3 }
  0x3c   : > { %2016 = vset.pattern.permute.xlu0 %v2136_v1  ;;  %2017 = vset.pattern.permute.xlu1 %v2136_v1  ;;  %v339_v8 = vand.u32 4294901760, %v314_v4  ;;  %v321_v10 = vld [vmem:[%s264_s13 + $0x38] sm:$0xff]  ;;  %v343_v11 = vand.u32 4294901760, %v316_v7  ;;  %v345_v12 = vand.u32 4294901760, %v319_v9  ;;  %v318_v14 = vld [vmem:[%s264_s13 + $0x20] sm:$0xff]  ;;  %v320_v15 = vld [vmem:[%s264_s13 + $0x30] sm:$0xff] }
  0x3d   : > { %v349_v13 = vand.u32 4294901760, %v321_v10  ;;  %v2295_v16 = vpack.c.bf16 %v341_v6, %v337_v5  ;;  %v347_v17 = vand.u32 4294901760, %v318_v14  ;;  %v351_v18 = vand.u32 4294901760, %v320_v15  ;;  %v322_v19 = vld [vmem:[%s2591_s1] sm:$0xf]  ;;  %v886_v30 = vld [vmem:[%s2594_s4 + $0x8] sm:$0xff] }
  0x3e   : > { %v2300_v20 = vsub.f32 %v315_v2, %v337_v5  ;;  %v2302_v21 = vpack.c.bf16 %v343_v11, %v339_v8  ;;  %v335_v23 = vsel %vm333_vm0, %v322_v19, 0  ;;  %v2307_v24 = vsub.f32 %v317_v3, %v341_v6  ;;  %v327_v25 = vld [vmem:[%s2592_s2] sm:$0xf]  ;;  %896 = vperm.xlu1 %2017, %v886_v30   ;;  %v887_v40 = vld [vmem:[%s2594_s4 + $0x10] sm:$0xff]  ;;  %v888_v53 = vld [vmem:[%s2594_s4 + $0x18] sm:$0xf] }
  0x3f   : > { %v2304_v22 = vpack.c.bf16 %v349_v13, %v345_v12  ;;  %1791 = vmatprep.subr.bf16.mxu0 %v2295_v16  ;;  %v2313_v26 = vpack.c.bf16 %v351_v18, %v347_v17  ;;  %v2315_v27 = vand.u32 4294901760, %v335_v23  ;;  %v2318_v29 = vsub.f32 %v314_v4, %v339_v8  ;;  %330 = vperm.xlu0 %2016, %v327_v25   ;;  %v885_v35 = vld [vmem:[%s2594_s4] sm:$0xff]  ;;  %v325_v3 = vld [vmem:[%s2593_s3 + $0x10] sm:$0xff]  ;;  %s1789_s30 = sshll.u32 %s2122_s24, 7  ;;  %s290_s14 = scalar_lea.vmem [#allocation5], %s1779_s8 }
  0x40   : > { %v423_v28 = vand.u32 4294901760, %v2300_v20  ;;  %1793 = vmatpush1.bf16.msra.mxu0 %v2302_v21  ;;  %v435_v31 = vand.u32 4294901760, %v2307_v24  ;;  %v2325_v32 = vsub.f32 %v316_v7, %v343_v11  ;;  %v2327_v33 = vsub.f32 %v319_v9, %v345_v12  ;;  %v326_v9 = vld [vmem:[%s2593_s3 + $0x18] sm:$0xf]  ;;  %s1645_s15 = sshll.u32 %s290_s14, 4  ;;  %s2526_s9 = scalar_lea.hbm %s2595_s5, %s1789_s30  ;;  %s2528_s15 = int_to_ptr.vmem [resolvable:$true] %s1645_s15 }
  0x41   : > { %v2329_v34 = vsub.f32 %v321_v10, %v349_v13  ;;  %1795 = vmatprep.subr.bf16.mxu0 %v2304_v22  ;;  %v2336_v36 = vsub.f32 %v335_v23, %v2315_v27  ;;  %v429_v38 = vand.u32 4294901760, %v2318_v29  ;;  %v2342_v39 = vsub.f32 %v318_v14, %v347_v17  ;;  %v323_v10 = vld [vmem:[%s2593_s3] sm:$0xff]  ;;  %s1620_s18 = scalar_lea.sflag [#allocation4], %s2285_s7  ;;  %s2048_s20 = scalar_lea.vmem %s2528_s15, 128 }
  0x42   : > { %v424_v37 = vsub.f32 %v2300_v20, %v423_v28  ;;  %v436_v41 = vsub.f32 %v2307_v24, %v435_v31  ;;  %v441_v42 = vand.u32 4294901760, %v2325_v32  ;;  %v447_v43 = vand.u32 4294901760, %v2327_v33  ;;  %901 = vperm.xlu1 %2017, %v887_v40   ;;  %p2049_p8 = scmp.ne.s32.totalorder %s2528_s15, %s2048_s20  ;;  %p2604_p9 = scmp.ne.s32.totalorder %s2600_s10, 0 }
  0x43   : > { %v459_v44 = vand.u32 4294901760, %v2329_v34  ;;  %v412_v45 = vand.u32 4294901760, %v2336_v36  ;;  %v430_v47 = vsub.f32 %v2318_v29, %v429_v38  ;;  %v453_v48 = vand.u32 4294901760, %v2342_v39  ;;  %891 = vperm.xlu0 %2016, %v885_v35   ;;  %s2137_s27 = smov [#allocation5]  }
  0x44   : > { %v425_v46 = vand.u32 4294901760, %v424_v37  ;;  %1797 = vmatpush1.bf16.msra.mxu0 %v2313_v26  ;;  %v437_v49 = vand.u32 4294901760, %v436_v41  ;;  %v442_v50 = vsub.f32 %v2325_v32, %v441_v42  ;;  %v448_v51 = vsub.f32 %v2327_v33, %v447_v43  ;;  %p2050_p11 = pnand %p2049_p8, %p2604_p9  ;;  %s2052_s28 = sshll.u32 %s2137_s27, 4  ;;  %s2053_s28 = int_to_ptr.vmem [resolvable:$false] %s2052_s28 }
  0x45   : > { %v460_v52 = vsub.f32 %v2329_v34, %v459_v44  ;;  %v413_v54 = vsub.f32 %v2336_v36, %v412_v45  ;;  %v431_v55 = vand.u32 4294901760, %v430_v47  ;;  %v454_v56 = vsub.f32 %v2342_v39, %v453_v48  ;;  %s2054_s17 = scalar_lea.vmem %s2053_s28, 256  ;;  %p2055_p6 = scmp.lt.s32.totalorder %s2528_s15, %s2053_s28 }
  0x46   : > { %v2377_v57 = vsub.f32 %v320_v15, %v351_v18  ;;  %v2379_v58 = vpack.c.bf16 %v437_v49, %v425_v46  ;;  %v443_v59 = vand.u32 4294901760, %v442_v50  ;;  %v449_v60 = vand.u32 4294901760, %v448_v51  ;;  %v324_v18 = vld [vmem:[%s2593_s3 + $0x8] sm:$0xff]  ;;  %p2051_p0 = pneg %p2050_p11  ;;  %p2056_p13 = scmp.lt.s32.totalorder %s2054_s17, %s2048_s20 }
  0x47   : > { %v461_v61 = vand.u32 4294901760, %v460_v52  ;;  %v414_v62 = vand.u32 4294901760, %v413_v54  ;;  %906 = vperm.xlu0 %2016, %v888_v53   ;;  %v455_v4 = vand.u32 4294901760, %v454_v56  ;;  %v916_v7 = vsel %vm333_vm0, %v325_v3, 0 }
  0x48   : > { %v465_v63 = vand.u32 4294901760, %v2377_v57  ;;  %1799 = vmatprep.subr.bf16.mxu0 %v2379_v58  ;;  %1886 = vmatprep.subr.bf16.mxu1 %v2379_v58  ;;  %v2384_v1 = vpack.c.bf16 %v443_v59, %v431_v55  ;;  %v1806_v8 = vpack.c.bf16 %v2307_v24, %v2300_v20  ;;  %v2410_v12 = vand.u32 4294901760, %v916_v7  ;;  %p2057_p2 = por %p2056_p13, %p2055_p6 }
  0x49   : > { %v2386_v2 = vpack.c.bf16 %v461_v61, %v449_v60  ;;  %415 = vmatmul.mubr.f32.vlgmr.msra.gmra.mrb[0].mxu0 %v414_v62  ;;  %v1808_v13 = vpack.c.bf16 %v2325_v32, %v2318_v29  ;;  %v919_v14 = vsel %vm333_vm0, %v326_v9, 0  ;;  %v910_v15 = vsel %vm333_vm0, %v323_v10, 0 }
  0x4a   : > { %v466_v5 = vsub.f32 %v2377_v57, %v465_v63  ;;  %1801 = vmatpush1.bf16.msra.mxu0 %v2384_v1  ;;  %1888 = vmatpush1.bf16.msra.mxu1 %v2384_v1  ;;  %v1810_v17 = vpack.c.bf16 %v2329_v34, %v2327_v33  ;;  %v2425_v19 = vand.u32 4294901760, %v919_v14  ;;  %v2427_v23 = vand.u32 4294901760, %v910_v15  ;;  %p2058_p5 = pnand %p2057_p2, %p2051_p0 }
  0x4b   : > { %1803 = vmatprep.subr.bf16.mxu0 %v2386_v2  ;;  %1887 = vmatprep.subr.bf16.mxu1 %v2386_v2  ;;  %v1812_v25 = vpack.c.bf16 %v2377_v57, %v2342_v39  ;;  %v913_v30 = vsel %vm333_vm0, %v324_v18, 0  ;;  %v1822_v41 = vpack.c.bf16 %v435_v31, %v423_v28  ;;  %v1017_v46 = vsub.f32 %v916_v7, %v2410_v12 }
  0x4c   : > { %v467_v6 = vand.u32 4294901760, %v466_v5  ;;  %525 = vmatprep.mubr.f32.mxu0 %v2135_v0  ;;  %v995_v35 = vsub.f32 %v910_v15, %v2427_v23  ;;  %v2436_v37 = vand.u32 4294901760, %v913_v30  ;;  %v1824_v47 = vpack.c.bf16 %v441_v42, %v429_v38 }
  0x4d   : > { %v1826_v20 = vpack.c.bf16 %v459_v44, %v447_v43  ;;  %v1028_v24 = vsub.f32 %v919_v14, %v2425_v19  ;;  %v1828_v28 = vpack.c.bf16 %v465_v63, %v453_v48  ;;  %v1018_v32 = vand.u32 4294901760, %v1017_v46 }
  0x4e   : > { %v2408_v11 = vpack.c.bf16 %v467_v6, %v455_v4  ;;  %v1006_v40 = vsub.f32 %v913_v30, %v2436_v37  ;;  %v996_v29 = vand.u32 4294901760, %v995_v35 }
  0x4f   : > { %v1029_v33 = vand.u32 4294901760, %v1028_v24 }
  0x50   : > { %1805 = vmatpush1.bf16.msra.mxu0 %v2408_v11  ;;  %1889 = vmatpush1.bf16.msra.mxu1 %v2408_v11  ;;  %v1007_v31 = vand.u32 4294901760, %v1006_v40  ;;  %v997_v34 = vsub.f32 %v995_v35, %v996_v29 }
  0x51   : > { %1807 = vmatprep.subr.bf16.mxu0 %v1806_v8  ;;  %1855 = vmatprep.subr.bf16.mxu1 %v1806_v8  ;;  %v1030_v42 = vsub.f32 %v1028_v24, %v1029_v33 }
  0x52   : > { %v1008_v38 = vsub.f32 %v1006_v40, %v1007_v31 }
  0x53   : > { %527 = vmatmul.mubr.f32.vlgmr.msra.gmra.mrb[0].mxu0 %v2315_v27  ;;  %1158 = vmatmul.mubr.f32.vlgmr.msra.gmra.mrb[0].mxu1 %v2410_v12 }
  0x54   : > { %1809 = vmatpush1.bf16.msra.mxu0 %v1808_v13  ;;  %1857 = vmatpush1.bf16.msra.mxu1 %v1808_v13 }
  0x55   : > { %1163 = vmatprep.mubr.f32.mxu1 %v2135_v0  ;;  %1811 = vmatprep.subr.bf16.mxu0 %v1810_v17 }
  0x56   : > { %1859 = vmatprep.subr.bf16.mxu1 %v1810_v17  ;;  %613 = vmatprep.mubr.f32.mxu0 %v2135_v0 }
  0x57   : > { %1165 = vmatmul.mubr.f32.gmra.mrb[2].mxu1 %v2425_v19 }
  0x58   : > { %1813 = vmatpush1.bf16.msra.mxu0 %v1812_v25  ;;  %1861 = vmatpush1.bf16.msra.mxu1 %v1812_v25 }
  0x59   : > { %1251 = vmatprep.mubr.f32.mxu1 %v2135_v0  ;;  %1815 = vmatprep.subr.bf16.mxu0 %v2295_v16 }
  0x5a   : > { %1863 = vmatprep.subr.bf16.mxu1 %v2295_v16 }
  0x5b   : > { %616 = vmatmul.mubr.f32.vlgmr.msra.gmra.mrb[0].mxu0 %v2336_v36  ;;  %1254 = vmatmul.mubr.f32.vlgmr.msra.gmra.mrb[4].mxu1 %v995_v35  ;;  %v998_v36 = vand.u32 4294901760, %v997_v34 }
  0x5c   : > { %1817 = vmatpush1.bf16.msra.mxu0 %v2302_v21  ;;  %1865 = vmatpush1.bf16.msra.mxu1 %v2302_v21 }
  0x5d   : > { %1259 = vmatprep.mubr.f32.mxu1 %v2135_v0  ;;  %1819 = vmatprep.subr.bf16.mxu0 %v2304_v22 }
  0x5e   : > { %694 = vmatprep.mubr.f32.mxu0 %v2135_v0  ;;  %1867 = vmatprep.subr.bf16.mxu1 %v2304_v22 }
  0x5f   : > { %1262 = vmatmul.mubr.f32.gmra.mrb[6].mxu1 %v1006_v40 }
  0x60   : > { %1821 = vmatpush1.bf16.msra.mxu0 %v2313_v26  ;;  %1267 = vmatprep.mubr.f32.mxu1 %v2135_v0 }
  0x61   : > { %1823 = vmatprep.subr.bf16.mxu0 %v1822_v41  ;;  %1869 = vmatpush1.bf16.msra.mxu1 %v2313_v26 }
  0x62   : > { %1871 = vmatprep.subr.bf16.mxu1 %v1822_v41 }
  0x63   : > { %698 = vmatmul.mubr.f32.vlgmr.msra.gmra.mrb[0].mxu0 %v412_v45  ;;  %1270 = vmatmul.mubr.f32.gmra.mrb[0].mxu1 %v1017_v46 }
  0x64   : > { %1825 = vmatpush1.bf16.msra.mxu0 %v1824_v47  ;;  %1275 = vmatprep.mubr.f32.mxu1 %v2135_v0 }
  0x65   : > { %1827 = vmatprep.subr.bf16.mxu0 %v1826_v20  ;;  %792 = vmatprep.mubr.f32.mxu0 %v2135_v0 }
  0x67   : > { %1278 = vmatmul.mubr.f32.gmra.mrb[2].mxu1 %v1028_v24 }
  0x68   : > { %1829 = vmatpush1.bf16.msra.mxu0 %v1828_v28  ;;  %1356 = vmatprep.mubr.f32.mxu1 %v2135_v0 }
  0x69   : > { %1831 = vmatprep.subr.bf16.mxu0 %v2295_v16 }
  0x6b   : > { %794 = vmatmul.mubr.f32.vlgmr.msra.gmra.mrb[0].mxu0 %v2315_v27  ;;  %1360 = vmatmul.mubr.f32.vlgmr.msra.gmra.mrb[4].mxu1 %v996_v29 }
  0x6c   : > { %1833 = vmatpush1.bf16.msra.mxu0 %v2302_v21  ;;  %1873 = vmatpush1.bf16.msra.mxu1 %v1824_v47 }
  0x6d   : > { %1365 = vmatprep.mubr.f32.mxu1 %v2135_v0  ;;  %1835 = vmatprep.subr.bf16.mxu0 %v2304_v22 }
  0x6e   : > { %872 = vmatprep.mubr.f32.mxu0 %v2135_v0  ;;  %1875 = vmatprep.subr.bf16.mxu1 %v1826_v20 }
  0x6f   : > { %1369 = vmatmul.mubr.f32.gmra.mrb[6].mxu1 %v1007_v31 }
  0x70   : > { %1837 = vmatpush1.bf16.msra.mxu0 %v2313_v26  ;;  %1374 = vmatprep.mubr.f32.mxu1 %v2135_v0 }
  0x71   : > { %1839 = vmatprep.subr.bf16.mxu0 %v2295_v16  ;;  %1877 = vmatpush1.bf16.msra.mxu1 %v1828_v28 }
  0x72   : > { %1879 = vmatprep.subr.bf16.mxu1 %v2295_v16  ;;  %v1009_v16 = vand.u32 4294901760, %v1008_v38 }
  0x73   : > { %874 = vmatmul.mubr.f32.vlgmr.msra.gmra.mrb[0].mxu0 %v2315_v27  ;;  %1378 = vmatmul.mubr.f32.gmra.mrb[0].mxu1 %v1018_v32  ;;  %v1019_v27 = vsub.f32 %v1017_v46, %v1018_v32 }
  0x74   : > { %1841 = vmatpush1.bf16.msra.mxu0 %v2302_v21  ;;  %1383 = vmatprep.mubr.f32.mxu1 %v2135_v0 }
  0x75   : > { %1843 = vmatprep.subr.bf16.mxu0 %v2304_v22  ;;  %993 = vmatprep.mubr.f32.mxu0 %v2135_v0  ;;  %v1020_v39 = vand.u32 4294901760, %v1019_v27 }
  0x77   : > { %1387 = vmatmul.mubr.f32.gmra.mrb[2].mxu1 %v1029_v33 }
  0x78   : > { %1845 = vmatpush1.bf16.msra.mxu0 %v2313_v26  ;;  %1481 = vmatprep.mubr.f32.mxu1 %v2135_v0 }
  0x79   : > { %1847 = vmatprep.subr.bf16.mxu0 %v2379_v58 }
  0x7b   : > { %999 = vmatmul.mubr.f32.vlgmr.msra.gmra.mrb[2].mxu0 %v998_v36  ;;  %1483 = vmatmul.mubr.f32.vlgmr.msra.gmra.mrb[4].mxu1 %v2427_v23 }
  0x7c   : > { %1881 = vmatpush1.bf16.msra.mxu1 %v2302_v21  ;;  %1004 = vmatprep.mubr.f32.mxu0 %v2135_v0  ;;  %v1031_v21 = vand.u32 4294901760, %v1030_v42 }
  0x7d   : > { %1488 = vmatprep.mubr.f32.mxu1 %v2135_v0  ;;  %1849 = vmatpush1.bf16.msra.mxu0 %v2384_v1 }
  0x7e   : > { %1883 = vmatprep.subr.bf16.mxu1 %v2304_v22  ;;  %1851 = vmatprep.subr.bf16.mxu0 %v2386_v2 }
  0x7f   : > { %1010 = vmatmul.mubr.f32.gmra.mrb[4].mxu0 %v1009_v16  ;;  %1490 = vmatmul.mubr.f32.gmra.mrb[6].mxu1 %v2436_v37 }
  0x80   : > { %1015 = vmatprep.mubr.f32.mxu0 %v2135_v0  ;;  %1495 = vmatprep.mubr.f32.mxu1 %v2135_v0 }
  0x81   : > { %1885 = vmatpush1.bf16.msra.mxu1 %v2313_v26  ;;  %1853 = vmatpush1.bf16.msra.mxu0 %v2408_v11 }
  0x83   : > { %1021 = vmatmul.mubr.f32.gmra.mrb[6].mxu0 %v1020_v39  ;;  %1497 = vmatmul.mubr.f32.gmra.mrb[0].mxu1 %v2410_v12 }
  0x84   : > { %1026 = vmatprep.mubr.f32.mxu0 %v2135_v0  ;;  %1502 = vmatprep.mubr.f32.mxu1 %v2135_v0 }
  0x87   : > { %1032 = vmatmul.mubr.f32.gmra.mrb[8].mxu0 %v1031_v21  ;;  %1504 = vmatmul.mubr.f32.gmra.mrb[2].mxu1 %v2425_v19 }
  0x88   : > { %1142 = vmatprep.mubr.f32.mxu0 %v2135_v0  ;;  %1582 = vmatprep.mubr.f32.mxu1 %v2135_v0 }
  0x8b   : > { %1144 = vmatmul.mubr.f32.vlgmr.msra.gmra.mrb[2].mxu0 %v2427_v23  ;;  %1584 = vmatmul.mubr.f32.vlgmr.msra.gmra.mrb[4].mxu1 %v2427_v23 }
  0x8c   : > { %1149 = vmatprep.mubr.f32.mxu0 %v2135_v0  ;;  %1589 = vmatprep.mubr.f32.mxu1 %v2135_v0 }
  0x8f   : > { %1151 = vmatmul.mubr.f32.gmra.mrb[4].mxu0 %v2436_v37  ;;  %1591 = vmatmul.mubr.f32.gmra.mrb[6].mxu1 %v2436_v37 }
  0x90   : > { %1596 = vmatprep.mubr.f32.mxu1 %v2135_v0 }
  0x93   : > { %1598 = vmatmul.mubr.f32.gmra.mrb[0].mxu1 %v2410_v12 }
  0x94   : > { %1603 = vmatprep.mubr.f32.mxu1 %v2135_v0 }
  0x97   : > { %1605 = vmatmul.mubr.f32.gmra.mrb[2].mxu1 %v2425_v19 }
  0xbe   : > { %v331_v22 = vpop.permute.xlu0 %330 }
 0x146   : > { %v875_v26 = vpop.f32.mrb[0].mxu0 }
 0x147   : > { %v1890_v43 = vadd.f32 %v875_v26, %v331_v22  ;;  %v877_v44 = vpop.f32.mrb[1].mxu0 }
 0x148   : > { %v1891_v45 = vadd.f32 %v877_v44, %v331_v22 }
 0x14a   : > { %v882_v48 = vcombine.low %v1890_v43, %v1891_v45 }
 0x14c   : > { %884 = vst [vmem:[%s290_s14] sm:$0xff] %v882_v48 }
 0x14d   : > { %2061 = shalt.err (!%p2058_p5)
}
 0x14e   : > { %s2062_s7 = scalar_lea.hbm %s2526_s9, 128  ;;  %s2066_s30 = scalar_lea.hbm %s2595_s5, 256 }
 0x14f   : > { %p2063_p4 = scmp.ne.s32.totalorder %s2526_s9, %s2062_s7  ;;  %p2067_p12 = scmp.lt.u32.totalorder %s2526_s9, %s2595_s5 }
 0x150   : > { %p2068_p1 = scmp.lt.u32.totalorder %s2066_s30, %s2062_s7  ;;  %p2070_p8 = scmp.lt.u32.totalorder %s2062_s7, %s2526_s9 }
 0x151   : > { %p2064_p7 = pnand %p2063_p4, %p2604_p9 }
 0x152   : > { %p2069_p3 = por %p2068_p1, %p2067_p12 }
 0x153   : > { %p2065_p10 = pneg %p2064_p7 }
 0x154   : > { %p2071_p11 = por %p2070_p8, %p2069_p3 }
 0x156   : > { %p2072_p0 = pnand %p2071_p11, %p2065_p10 }
 0x158   : > { %2075 = shalt.err (!%p2072_p0)
}
 0x159   : > { %1952 = dma.vmem_to_hbm [thread:$0]  (%p2604_p9), %s2528_s15, 128, %s2526_s9, %s1620_s18   ;;  %v1022_v0 = vpop.f32.mrb[6].mxu0  ;;  %v897_v51 = vpop.permute.xlu1 %896 }
 0x15a   : > { %p305_p6 = scmp.lt.s32.totalorder %s2122_s24, 1  ;;  %v1024_v49 = vpop.f32.mrb[7].mxu0  ;;  %v892_v53 = vpop.permute.xlu0 %891 }
 0x15b   : > { %v1033_v50 = vpop.f32.mrb[8].mxu0 }
 0x15c   : > { %s2615_s24 = smov (!%p305_p6, %s2122_s24), 1  ;;  %v1035_v52 = vpop.f32.mrb[9].mxu0 }
 0x15d   : > { %s1788_s13 = sshll.u32 %s2615_s24, 6  ;;  %v902_v60 = vpop.permute.xlu1 %901 }
 0x15e   : > { %v1145_v54 = vpop.f32.mrb[2].mxu0  ;;  %v1585_v55 = vpop.f32.mrb[4].mxu1  ;;  %s2557_s27 = scalar_lea.vmem %s2596_s6, %s1788_s13  ;;  %v1023_v6 = vadd.f32 %v1022_v0, %v902_v60  ;;  %v1025_v8 = vadd.f32 %v1024_v49, %v902_v60 }
 0x15f   : > { %v1892_v56 = vadd.f32 %v1145_v54, %v892_v53  ;;  %v1147_v57 = vpop.f32.mrb[3].mxu0  ;;  %v1587_v58 = vpop.f32.mrb[5].mxu1 }
 0x160   : > { %v1894_v59 = vadd.f32 %v1147_v57, %v892_v53  ;;  %v907_v9 = vpop.permute.xlu0 %906 }
 0x161   : > { %v1893_v61 = vadd.f32 %v1892_v56, %v1585_v55  ;;  %v1034_v15 = vadd.f32 %v1033_v50, %v907_v9  ;;  %v1036_v17 = vadd.f32 %v1035_v52, %v907_v9 }
 0x162   : > { %v1895_v62 = vadd.f32 %v1894_v59, %v1587_v58  ;;  %v1152_v63 = vpop.f32.mrb[4].mxu0  ;;  %v1592_v1 = vpop.f32.mrb[6].mxu1 }
 0x163   : > { %1611 = vst [vmem:[%s2557_s27] sm:$0xff] %v1893_v61  ;;  %v1896_v2 = vadd.f32 %v1152_v63, %v897_v51  ;;  %v1154_v3 = vpop.f32.mrb[5].mxu0  ;;  %v1594_v4 = vpop.f32.mrb[7].mxu1 }
 0x164   : > { %1612 = vst [vmem:[%s2557_s27 + $0x8] sm:$0xff] %v1895_v62  ;;  %v1898_v5 = vadd.f32 %v1154_v3, %v897_v51 }
 0x165   : > { %v1897_v7 = vadd.f32 %v1896_v2, %v1592_v1 }
 0x166   : > { %v1899_v10 = vadd.f32 %v1898_v5, %v1594_v4  ;;  %v1599_v11 = vpop.f32.mrb[0].mxu1 }
 0x167   : > { %1613 = vst [vmem:[%s2557_s27 + $0x10] sm:$0xff] %v1897_v7  ;;  %v1901_v12 = vadd.f32 %v1599_v11, %v1023_v6  ;;  %v1601_v13 = vpop.f32.mrb[1].mxu1 }
 0x168   : > { %1614 = vst [vmem:[%s2557_s27 + $0x18] sm:$0xff] %v1899_v10  ;;  %v1903_v14 = vadd.f32 %v1601_v13, %v1025_v8 }
 0x169   : > { %1615 = vst [vmem:[%s2557_s27 + $0x20] sm:$0xff] %v1901_v12 }
 0x16a   : > { %1616 = vst [vmem:[%s2557_s27 + $0x28] sm:$0xff] %v1903_v14  ;;  %v1606_v18 = vpop.f32.mrb[2].mxu1 }
 0x16b   : > { %v1905_v19 = vadd.f32 %v1606_v18, %v1034_v15  ;;  %v1608_v23 = vpop.f32.mrb[3].mxu1 }
 0x16c   : > { %v1907_v25 = vadd.f32 %v1608_v23, %v1036_v17 }
 0x16d   : > { %1617 = vst [vmem:[%s2557_s27 + $0x30] sm:$0xf] %v1905_v19 }
 0x16e   : > { %1618 = vst [vmem:[%s2557_s27 + $0x38] sm:$0xf] %v1907_v25 }
 0x16f PF: > { %s1661_s24 = sand.u32 1, %s2110_s21   ;;  %p2605_p9 = scmp.ne.s32.totalorder %s2601_s12, 0 }
 0x170   : > { %p2606_p13 = scmp.ge.s32.totalorder %s2130_s26, 2  ;;  %s1662_s15 = scalar_lea.sflag [#allocation4], %s1661_s24 }
 0x172   : > { %p1959_p2 = pnand %p2606_p13, %p2605_p9 }
 0x174   : > { %2105 = dma.done.wait (!%p1959_p2), %s1662_s15, 128  }
 0x175   : > { %2107 = vsyncadd (!%p1959_p2), %s1662_s15, 4294967168  ;;  %s23_s26 = sadd.s32 1, %s2130_s26   ;;  %s2607_s21 = smov %s2114_s22 }
 0x176   : > { %p20_p5 = scmp.ge.s32.totalorder %s23_s26, 4   ;;  %s2608_s22 = smov %s2118_s23 }
 0x177   : > { %s2609_s23 = smov %s2229_s11  ;;  %s2610_s24 = smov %s2126_s25 }
 0x178   : > { %s2611_s25 = smov %s2613_s29  ;;  %22 = sbr.rel (!%p20_p5) target bundleno = 6 (0x6), region = 97 }
 0x17f   :  { %1679 = vsyncpa [#allocation3], 1 }
 0x180   :  { %1681 = vsyncpa [#allocation3 + $0x1], 1 }
 0x181   :  { %1682 = vsyncpa [#allocation4], 1 }
 0x182   :  { %1684 = vsyncpa [#allocation4 + $0x1], 1 }

</bundles_post_ra>
